<compile_context>
chip_gen: v6e
topology: v6e:2x2x1
jax: 0.10.0
libtpu: 0.0.40
codegen_flags: <defaults>
</compile_context>

<pallas_src>
import functools

import jax
import jax.numpy as jnp
from jax.experimental import pallas as pl
from jax.experimental.pallas import tpu as pltpu


def _round_up(x, m):
    return ((x + m - 1) // m) * m


def _cdiv(a, b):
    return -(-a // b)


def _const_offsets(f1, f2):
    """Lane-aligned (multiple-of-128) offsets inside the packed constants row."""
    off_b2 = _round_up(f1, 128)
    off_w3 = off_b2 + _round_up(f2, 128)
    off_b3 = off_w3 + _round_up(f2, 128)
    width = off_b3 + 128
    return off_b2, off_w3, off_b3, width


def _critic_kernel(s_ref, a_ref, w1_ref, w2s_ref, w2a_ref, c_ref, out_ref,
                   *, f1, f2, off_b2, off_w3, off_b3):
    cdt = w1_ref.dtype  # MXU input dtype (f32 or bf16); accum/bias/ReLU stay f32.

    # Packed constants: [ b1 | b2 | w3_row | b3 ] at lane-aligned static offsets.
    b1 = c_ref[:, 0:f1]                        # (1, F1)
    b2 = c_ref[:, off_b2:off_b2 + f2]          # (1, F2)
    w3 = c_ref[:, off_w3:off_w3 + f2].astype(cdt)   # (1, F2)
    b3 = c_ref[:, off_b3:off_b3 + 1]           # (1, 1)

    # fc1: the 1/9 input scale is pre-folded into w1_ref (see prepare_critic_params).
    h1 = jnp.dot(s_ref[...].astype(cdt), w1_ref[...],
                 preferred_element_type=jnp.float32) + b1
    h1 = jnp.maximum(h1, 0.0)                  # (TB, F1) f32

    # fc2: concat([h1, action]) realized algebraically via split weights.
    h2 = (jnp.dot(h1.astype(cdt), w2s_ref[...], preferred_element_type=jnp.float32)
          + jnp.dot(a_ref[...].astype(cdt), w2a_ref[...],
                    preferred_element_type=jnp.float32)
          + b2)
    h2 = jnp.maximum(h2, 0.0)                  # (TB, F2) f32

    # fc3: contract the F2 axis of (1,F2)·(TB,F2) -> lane-dense (1, TB) row,
    # so the output store is a single dense row instead of TB masked column stores.
    h3 = jax.lax.dot_general(w3, h2.astype(cdt),
                             (((1,), (1,)), ((), ())),
                             preferred_element_type=jnp.float32)   # (1, TB)
    out_ref[0] = jnp.maximum(h3 + b3, 0.0)


def prepare_critic_params(params, *, compute_dtype=jnp.float32):
    """One-time transform: pre-transpose / split weights, fold 1/9, pack constants."""
    w1, b1 = params["w1"], params["b1"]
    w2, b2 = params["w2"], params["b2"]
    w3, b3 = params["w3"], params["b3"]
    f1 = w1.shape[0]
    f2 = w2.shape[0]

    off_b2, off_w3, off_b3, width = _const_offsets(f1, f2)
    consts = jnp.zeros((1, width), jnp.float32)
    consts = consts.at[0, :f1].set(b1.astype(jnp.float32))
    consts = consts.at[0, off_b2:off_b2 + f2].set(b2.astype(jnp.float32))
    consts = consts.at[0, off_w3:off_w3 + f2].set(
        w3.reshape(f2).astype(jnp.float32))
    consts = consts.at[0, off_b3].set(b3.reshape(()).astype(jnp.float32))

    return {
        "w1_t":  (w1.T * (1.0 / 9.0)).astype(compute_dtype),   # [S, F1], 1/9 folded
        "w2s_t": w2[:, :f1].T.astype(compute_dtype),            # [F1, F2] (h1 part)
        "w2a_t": w2[:, f1:].T.astype(compute_dtype),            # [A,  F2] (action part)
        "consts": consts,                                       # [1, width] f32
    }


@functools.partial(jax.jit, static_argnames=("block_b",))
def critic_forward(state, action, prepped, *, block_b=1024):
    """state: [B, S] f32, action: [B, A] f32. Returns [B, 1] f32."""
    B, S = state.shape
    A = action.shape[1]
    w1_t, w2s_t, w2a_t, consts = (prepped["w1_t"], prepped["w2s_t"],
                                  prepped["w2a_t"], prepped["consts"])
    F1 = w1_t.shape[1]
    F2 = w2s_t.shape[1]
    CW = consts.shape[1]
    off_b2, off_w3, off_b3, width = _const_offsets(F1, F2)
    assert width == CW

    # Batch tile: as large as block_b (pipeline-overhead bound kernel), multiple of
    # 8 (f32 sublane); for larger batches cap at cdiv(B,2) so the grid has >= 2
    # steps and the "parallel" batch axis can shard across both v7x TensorCores.
    cap = _cdiv(B, 2) if B >= 256 else B
    TB = max(8, _round_up(min(block_b, cap), 8))
    G = _cdiv(B, TB)   # ragged last tile handled by Pallas; no wrapper-side pad.

    kernel = functools.partial(_critic_kernel, f1=F1, f2=F2,
                               off_b2=off_b2, off_w3=off_w3, off_b3=off_b3)

    out = pl.pallas_call(
        kernel,
        out_shape=jax.ShapeDtypeStruct((G, 1, TB), jnp.float32),
        grid=(G,),
        in_specs=[
            pl.BlockSpec((TB, S), lambda i: (i, 0)),    # state   (tiled over batch)
            pl.BlockSpec((TB, A), lambda i: (i, 0)),    # action  (tiled over batch)
            pl.BlockSpec((S, F1), lambda i: (0, 0)),    # w1.T/9      (VMEM-resident)
            pl.BlockSpec((F1, F2), lambda i: (0, 0)),   # w2[:, :F1].T
            pl.BlockSpec((A, F2), lambda i: (0, 0)),    # w2[:, F1:].T
            pl.BlockSpec((1, CW), lambda i: (0, 0)),    # packed b1|b2|w3|b3
        ],
        out_specs=pl.BlockSpec((1, 1, TB), lambda i: (i, 0, 0)),  # lane-dense row
        compiler_params=pltpu.CompilerParams(
            dimension_semantics=("parallel",)),
    )(state, action, w1_t, w2s_t, w2a_t, consts)

    # (G, 1, TB) lane-dense rows -> (B, 1); garbage tail rows (>= B) are dropped.
    return out.reshape(G * TB, 1)[:B]


def init_critic_params(key, state_size, action_size, fc1_units=128, fc2_units=64):
    """Deterministic init mimicking torch.nn.Linear default (U[-1/sqrt(fan_in), +])."""
    ks = jax.random.split(key, 6)

    def linear(kw, kb, fan_in, fan_out):
        bound = 1.0 / jnp.sqrt(fan_in)
        w = jax.random.uniform(kw, (fan_out, fan_in), jnp.float32, -bound, bound)
        b = jax.random.uniform(kb, (fan_out,), jnp.float32, -bound, bound)
        return w, b

    w1, b1 = linear(ks[0], ks[1], state_size, fc1_units)
    w2, b2 = linear(ks[2], ks[3], fc1_units + action_size, fc2_units)
    w3, b3 = linear(ks[4], ks[5], fc2_units, 1)
    return {"w1": w1, "b1": b1, "w2": w2, "b2": b2, "w3": w3, "b3": b3}


def critic_reference(state, action, p):
    """Plain-JAX reference of the PyTorch forward, for correctness checks."""
    s = state / 9.0
    h1 = jax.nn.relu(s @ p["w1"].T + p["b1"])
    x = jnp.concatenate([h1, action], axis=1)
    h2 = jax.nn.relu(x @ p["w2"].T + p["b2"])
    return jax.nn.relu(h2 @ p["w3"].T + p["b3"])


if __name__ == "__main__":
    STATE, ACTION = 32, 4
    key = jax.random.PRNGKey(0)
    k_s, k_a, k_p, k_s2, k_a2 = jax.random.split(key, 5)

    params = init_critic_params(k_p, STATE, ACTION, fc1_units=128, fc2_units=64)
    prepped = prepare_critic_params(params)            # one-time weight prep (f32)

    # Small batch (typical single-env critic evaluation).
    B = 8
    state = jax.random.normal(k_s, (B, STATE), jnp.float32) * 3.0
    action = jax.random.normal(k_a, (B, ACTION), jnp.float32)
    out = jax.block_until_ready(critic_forward(state, action, prepped))
    ref = critic_reference(state, action, params)
    assert out.shape == (B, 1), out.shape
    assert jnp.allclose(out, ref, atol=1e-5, rtol=1e-5), (
        f"max err {jnp.max(jnp.abs(out - ref))}")

    # Non-multiple-of-8 batch: single ragged tile, no wrapper-side padding.
    B2 = 37
    state2 = jax.random.normal(jax.random.PRNGKey(1), (B2, STATE), jnp.float32) * 3.0
    action2 = jax.random.normal(jax.random.PRNGKey(2), (B2, ACTION), jnp.float32)
    out2 = jax.block_until_ready(critic_forward(state2, action2, prepped))
    ref2 = critic_reference(state2, action2, params)
    assert out2.shape == (B2, 1), out2.shape
    assert jnp.allclose(out2, ref2, atol=1e-5, rtol=1e-5), (
        f"max err {jnp.max(jnp.abs(out2 - ref2))}")

    # Multi-tile grid (2 parallel steps -> both v7x TCs) with a ragged last tile.
    B3 = 300
    state3 = jax.random.normal(k_s2, (B3, STATE), jnp.float32) * 3.0
    action3 = jax.random.normal(k_a2, (B3, ACTION), jnp.float32)
    out3 = jax.block_until_ready(critic_forward(state3, action3, prepped))
    ref3 = critic_reference(state3, action3, params)
    assert out3.shape == (B3, 1), out3.shape
    assert jnp.allclose(out3, ref3, atol=1e-5, rtol=1e-5), (
        f"max err {jnp.max(jnp.abs(out3 - ref3))}")

    # bf16 MXU path (f32 accumulation) for large-batch / training use.
    prepped_bf16 = prepare_critic_params(params, compute_dtype=jnp.bfloat16)
    out_bf = jax.block_until_ready(critic_forward(state3, action3, prepped_bf16))
    assert out_bf.shape == (B3, 1), out_bf.shape
    assert bool(jnp.all(jnp.isfinite(out_bf)))
    assert jnp.allclose(out_bf, ref3, atol=2e-2, rtol=0.0), (
        f"max err {jnp.max(jnp.abs(out_bf - ref3))}")

    print("KERNEL_OK")
</pallas_src>

<mosaic_0001>
module attributes {stable_mosaic.version = 11 : i64} {
  func.func @_critic_kernel(%arg0: i32, %arg1: memref<8x32xf32, #tpu.memory_space<vmem>>, %arg2: memref<8x4xf32, #tpu.memory_space<vmem>>, %arg3: memref<32x128xf32, #tpu.memory_space<vmem>>, %arg4: memref<128x64xf32, #tpu.memory_space<vmem>>, %arg5: memref<4x64xf32, #tpu.memory_space<vmem>>, %arg6: memref<1x512xf32, #tpu.memory_space<vmem>>, %arg7: memref<1x1x8xf32, #tpu.memory_space<vmem>>) attributes {dimension_semantics = [#tpu.dimension_semantics<parallel>], iteration_bounds = array<i64: 1>, scalar_prefetch = 0 : i64, scratch_operands = 0 : i64, tpu.core_type = #tpu.core_type<tc>, window_params = [{transform_indices = @transform_0, window_bounds = array<i64: 8, 32>}, {transform_indices = @transform_1, window_bounds = array<i64: 8, 4>}, {pipeline_mode = #tpu.pipeline_mode<synchronous>, transform_indices = @transform_2, window_bounds = array<i64: 32, 128>}, {pipeline_mode = #tpu.pipeline_mode<synchronous>, transform_indices = @transform_3, window_bounds = array<i64: 128, 64>}, {pipeline_mode = #tpu.pipeline_mode<synchronous>, transform_indices = @transform_4, window_bounds = array<i64: 4, 64>}, {pipeline_mode = #tpu.pipeline_mode<synchronous>, transform_indices = @transform_5, window_bounds = array<i64: 1, 512>}, {transform_indices = @transform_6, window_bounds = array<i64: 1, 1, 8>}]} {
    %c0 = arith.constant 0 : index
    %c0_0 = arith.constant 0 : index
    %0 = vector.load %arg6[%c0, %c0_0] : memref<1x512xf32, #tpu.memory_space<vmem>>, vector<1x128xf32>
    %c0_1 = arith.constant 0 : index
    %c128 = arith.constant 128 : index
    %1 = vector.load %arg6[%c0_1, %c128] : memref<1x512xf32, #tpu.memory_space<vmem>>, vector<1x64xf32>
    %c0_2 = arith.constant 0 : index
    %c256 = arith.constant 256 : index
    %2 = vector.load %arg6[%c0_2, %c256] : memref<1x512xf32, #tpu.memory_space<vmem>>, vector<1x64xf32>
    %c0_3 = arith.constant 0 : index
    %c384 = arith.constant 384 : index
    %3 = vector.load %arg6[%c0_3, %c384] : memref<1x512xf32, #tpu.memory_space<vmem>>, vector<1x1xf32>
    %c0_4 = arith.constant 0 : index
    %c0_5 = arith.constant 0 : index
    %4 = vector.load %arg1[%c0_4, %c0_5] : memref<8x32xf32, #tpu.memory_space<vmem>>, vector<8x32xf32>
    %c0_6 = arith.constant 0 : index
    %c0_7 = arith.constant 0 : index
    %5 = vector.load %arg3[%c0_6, %c0_7] : memref<32x128xf32, #tpu.memory_space<vmem>>, vector<32x128xf32>
    %cst = arith.constant dense<0.000000e+00> : vector<8x128xf32>
    %6 = tpu.matmul %4, %5, %cst {dimension_numbers = #tpu.dot_dimension_numbers<[1], [0], [0], [1], [0, 0, 1, 1], [], []>} : vector<8x32xf32>, vector<32x128xf32>, vector<8x128xf32> -> vector<8x128xf32>
    %7 = vector.broadcast %0 : vector<1x128xf32> to vector<8x128xf32>
    %8 = arith.addf %6, %7 : vector<8x128xf32>
    %cst_8 = arith.constant 0.000000e+00 : f32
    %9 = vector.broadcast %cst_8 : f32 to vector<8x128xf32>
    %10 = arith.maximumf %8, %9 : vector<8x128xf32>
    %c0_9 = arith.constant 0 : index
    %c0_10 = arith.constant 0 : index
    %11 = vector.load %arg4[%c0_9, %c0_10] : memref<128x64xf32, #tpu.memory_space<vmem>>, vector<128x64xf32>
    %cst_11 = arith.constant dense<0.000000e+00> : vector<8x64xf32>
    %12 = tpu.matmul %10, %11, %cst_11 {dimension_numbers = #tpu.dot_dimension_numbers<[1], [0], [0], [1], [0, 0, 1, 1], [], []>} : vector<8x128xf32>, vector<128x64xf32>, vector<8x64xf32> -> vector<8x64xf32>
    %c0_12 = arith.constant 0 : index
    %c0_13 = arith.constant 0 : index
    %13 = vector.load %arg2[%c0_12, %c0_13] : memref<8x4xf32, #tpu.memory_space<vmem>>, vector<8x4xf32>
    %c0_14 = arith.constant 0 : index
    %c0_15 = arith.constant 0 : index
    %14 = vector.load %arg5[%c0_14, %c0_15] : memref<4x64xf32, #tpu.memory_space<vmem>>, vector<4x64xf32>
    %cst_16 = arith.constant dense<0.000000e+00> : vector<8x64xf32>
    %15 = tpu.matmul %13, %14, %cst_16 {dimension_numbers = #tpu.dot_dimension_numbers<[1], [0], [0], [1], [0, 0, 1, 1], [], []>} : vector<8x4xf32>, vector<4x64xf32>, vector<8x64xf32> -> vector<8x64xf32>
    %16 = arith.addf %12, %15 : vector<8x64xf32>
    %17 = vector.broadcast %1 : vector<1x64xf32> to vector<8x64xf32>
    %18 = arith.addf %16, %17 : vector<8x64xf32>
    %cst_17 = arith.constant 0.000000e+00 : f32
    %19 = vector.broadcast %cst_17 : f32 to vector<8x64xf32>
    %20 = arith.maximumf %18, %19 : vector<8x64xf32>
    %cst_18 = arith.constant dense<0.000000e+00> : vector<1x8xf32>
    %21 = tpu.matmul %2, %20, %cst_18 {dimension_numbers = #tpu.dot_dimension_numbers<[1], [1], [0], [0], [0, 0, 1, 0], [], []>} : vector<1x64xf32>, vector<8x64xf32>, vector<1x8xf32> -> vector<1x8xf32>
    %22 = vector.broadcast %3 : vector<1x1xf32> to vector<1x8xf32>
    %23 = arith.addf %21, %22 : vector<1x8xf32>
    %cst_19 = arith.constant 0.000000e+00 : f32
    %24 = vector.broadcast %cst_19 : f32 to vector<1x8xf32>
    %25 = arith.maximumf %23, %24 : vector<1x8xf32>
    %c0_20 = arith.constant 0 : index
    %c0_21 = arith.constant 0 : index
    %c0_22 = arith.constant 0 : index
    %26 = vector.load %arg7[%c0_20, %c0_21, %c0_22] : memref<1x1x8xf32, #tpu.memory_space<vmem>>, vector<1x1x8xf32>
    %27 = vector.shape_cast %26 : vector<1x1x8xf32> to vector<1x8xf32>
    %28 = vector.shape_cast %25 : vector<1x8xf32> to vector<1x1x8xf32>
    tpu.vector_store %arg7[%c0_20, %c0_21, %c0_22], %28 {strides = array<i32>} : memref<1x1x8xf32, #tpu.memory_space<vmem>>, vector<1x1x8xf32>,
    return
  }
  func.func @transform_0(%arg0: i32) -> (i32, i32) {
    %c0_i32 = arith.constant 0 : i32
    %c0_i32_0 = arith.constant 0 : i32
    return %arg0, %c0_i32 : i32, i32
  }
  func.func @transform_1(%arg0: i32) -> (i32, i32) {
    %c0_i32 = arith.constant 0 : i32
    %c0_i32_0 = arith.constant 0 : i32
    return %arg0, %c0_i32 : i32, i32
  }
  func.func @transform_2(%arg0: i32) -> (i32, i32) {
    %c0_i32 = arith.constant 0 : i32
    %c0_i32_0 = arith.constant 0 : i32
    %c0_i32_1 = arith.constant 0 : i32
    return %c0_i32, %c0_i32_0 : i32, i32
  }
  func.func @transform_3(%arg0: i32) -> (i32, i32) {
    %c0_i32 = arith.constant 0 : i32
    %c0_i32_0 = arith.constant 0 : i32
    %c0_i32_1 = arith.constant 0 : i32
    return %c0_i32, %c0_i32_0 : i32, i32
  }
  func.func @transform_4(%arg0: i32) -> (i32, i32) {
    %c0_i32 = arith.constant 0 : i32
    %c0_i32_0 = arith.constant 0 : i32
    %c0_i32_1 = arith.constant 0 : i32
    return %c0_i32, %c0_i32_0 : i32, i32
  }
  func.func @transform_5(%arg0: i32) -> (i32, i32) {
    %c0_i32 = arith.constant 0 : i32
    %c0_i32_0 = arith.constant 0 : i32
    %c0_i32_1 = arith.constant 0 : i32
    return %c0_i32, %c0_i32_0 : i32, i32
  }
  func.func @transform_6(%arg0: i32) -> (i32, i32, i32) {
    %c0_i32 = arith.constant 0 : i32
    %c0_i32_0 = arith.constant 0 : i32
    %c0_i32_1 = arith.constant 0 : i32
    return %arg0, %c0_i32, %c0_i32_0 : i32, i32, i32
  }
}

</mosaic_0001>

<bundles_post_ra>
// kernel: critic_forward.1
= control target key start
LH: loop header
LB: loop body
LE: loop exit
PB: predicated region body
PF: predicated region fallthrough
CT: control target
= control target key end

     0   :  { %v507_v1 = vmov 0.0   ;;  %vm508_vm0 = vmmov 0   ;;  %vm39_vm1 = vcmask 261120   ;;  %s660_s0 = inlined_call_operand.vmem [shape: f32[8,32], index: 0, kind: input, shape index: {}]   ;;  %s661_s1 = inlined_call_operand.vmem [shape: f32[8,4], index: 1, kind: input, shape index: {}]   ;;  %s662_s2 = inlined_call_operand.vmem [shape: f32[32,128], index: 2, kind: input, shape index: {}]   ;;  %s663_s3 = inlined_call_operand.vmem [shape: f32[128,64], index: 3, kind: input, shape index: {}]   ;;  %s664_s4 = inlined_call_operand.vmem [shape: f32[4,64], index: 4, kind: input, shape index: {}]   ;;  %s665_s5 = inlined_call_operand.vmem [shape: f32[1,512], index: 5, kind: input, shape index: {}]   ;;  %s666_s6 = inlined_call_operand.hbm [shape: f32[1,1,8], index: 6, kind: output, shape index: {}]  }
   0x1   :  { %v32_v0 = vld [vmem:[%s662_s2 + $0x18] sm:$0xff]  ;;  %424 = vmatprep.subr.mxu0 %v507_v1  ;;  %v31_v2 = vld [vmem:[%s662_s2 + $0x10] sm:$0xff]  ;;  %432 = vmatprep.mubr.msk.f32.mxu0 %vm508_vm0, %v507_v1  ;;  %v30_v5 = vld [vmem:[%s662_s2 + $0x8] sm:$0xff] }
   0x2   :  { %v129_v3 = vld [vmem:[%s663_s3 + $0x78] sm:$0xff]  ;;  %425 = vmatpush3.msra.mxu0 %v32_v0  ;;  %440 = vmatprep.subr.mxu1 %v507_v1  ;;  %v128_v4 = vld [vmem:[%s663_s3 + $0x70] sm:$0xff]  ;;  %v127_v6 = vld [vmem:[%s663_s3 + $0x68] sm:$0xff] }
   0x3   :  { %426 = vmatprep.subr.mxu0 %v507_v1  ;;  %441 = vmatpush3.msra.mxu1 %v129_v3  ;;  %v29_v7 = vld [vmem:[%s662_s2] sm:$0xff] }
   0x4   :  { %427 = vmatpush3.msra.mxu0 %v31_v2  ;;  %442 = vmatprep.subr.mxu1 %v507_v1  ;;  %v28_v8 = vld [vmem:[%s660_s0] sm:$0xff] }
   0x5   :  { %428 = vmatprep.subr.mxu0 %v507_v1  ;;  %443 = vmatpush3.msra.mxu1 %v128_v4  ;;  %v126_v9 = vld [vmem:[%s663_s3 + $0x60] sm:$0xff] }
   0x6   :  { %429 = vmatpush3.msra.mxu0 %v30_v5  ;;  %444 = vmatprep.subr.mxu1 %v507_v1 }
   0x7   :  { %11 = vsyncpa [#allocation3], 0  ;;  %430 = vmatprep.subr.mxu0 %v507_v1  ;;  %445 = vmatpush3.msra.mxu1 %v127_v6  ;;  %v125_v10 = vld [vmem:[%s663_s3 + $0x58] sm:$0xff]  ;;  %v124_v11 = vld [vmem:[%s663_s3 + $0x50] sm:$0xff]  ;;  %vm136_vm2 = vcmask 1043456   ;;  %vm132_vm3 = vcmask 31744   ;;  %v293_v40 = vlaneseq }
   0x8   :  { %431 = vmatpush3.msra.mxu0 %v29_v7  ;;  %446 = vmatprep.subr.mxu1 %v507_v1  ;;  %v123_v12 = vld [vmem:[%s663_s3 + $0x48] sm:$0xff]  ;;  %v122_v13 = vld [vmem:[%s663_s3 + $0x40] sm:$0xff]  ;;  %v121_v14 = vld [vmem:[%s663_s3 + $0x38] sm:$0xff]  ;;  %v509_v32 = vmov 0   ;;  %vm297_vm4 = vcmask 523264   ;;  %s510_s20 = smov [#allocation2]  }
   0x9   :  { %433 = vmatmul.mubr.msk.f32.vlgmr.msra.gmra.mxu0 %vm39_vm1, %v28_v8  ;;  %447 = vmatpush3.msra.mxu1 %v126_v9  ;;  %v120_v15 = vld [vmem:[%s663_s3 + $0x30] sm:$0xff]  ;;  %v119_v16 = vld [vmem:[%s663_s3 + $0x28] sm:$0xff]  ;;  %v118_v17 = vld [vmem:[%s663_s3 + $0x20] sm:$0xff]  ;;  %v294_v41 = vshrl.u32 %v293_v40, 7  ;;  %s383_s21 = sshll.u32 %s510_s20, 4  ;;  %vm375_vm5 = vcmask 57344   ;;  %s384_s21 = int_to_ptr.vmem [resolvable:$true] %s383_s21 }
   0xa   :  { %448 = vmatprep.subr.mxu1 %v507_v1  ;;  %435 = vmatprep.subr.mxu0 %v507_v1  ;;  %v117_v18 = vld [vmem:[%s663_s3 + $0x18] sm:$0xff]  ;;  %v116_v19 = vld [vmem:[%s663_s3 + $0x10] sm:$0xff]  ;;  %v131_v20 = vld [vmem:[%s664_s4] sm:$0xf]  ;;  %s485_s22 = scalar_lea.vmem %s384_s21, 16  ;;  %s489_s23 = scalar_lea.vmem %s384_s21, 32 }
   0xb   :  { %449 = vmatpush3.msra.mxu1 %v125_v10  ;;  %437 = vmatprep.mubr.msk.f32.mxu0 %vm508_vm0, %v507_v1  ;;  %v115_v21 = vld [vmem:[%s663_s3 + $0x8] sm:$0xff]  ;;  %v130_v22 = vld [vmem:[%s661_s1] sm:$0xff]  ;;  %v295_v42 = vsub.s32 0, %v294_v41  ;;  %p486_p0 = scmp.ne.s32.totalorder %s384_s21, %s485_s22  ;;  %p490_p1 = scmp.lt.s32.totalorder %s384_s21, %s384_s21 }
   0xc   :  { %450 = vmatprep.subr.mxu1 %v507_v1  ;;  %472 = vmatprep.mubr.msk.f32.mxu1 %vm508_vm0, %v507_v1  ;;  %v114_v23 = vld [vmem:[%s663_s3] sm:$0xff]  ;;  %p491_p2 = scmp.lt.s32.totalorder %s489_s23, %s485_s22 }
   0xd   :  { %451 = vmatpush3.msra.mxu1 %v124_v11  ;;  %436 = vmatpush3.msk.msra.mxu0 %vm136_vm2, %v131_v20  ;;  %v391_v24 = vld [vmem:[%s665_s5] ss:$0 sm:$0xff]  ;;  %v27_v31 = vld [vmem:[%s665_s5 + $0x3] sm:$0x1]  ;;  %v395_v33 = vld [vmem:[%s665_s5 + $0x1] ss:$0 sm:$0xff] }
   0xe   :  { %452 = vmatprep.subr.mxu1 %v507_v1  ;;  %438 = vmatmul.mubr.msk.f32.vlgmr.msra.gmra.mxu0 %vm132_vm3, %v130_v22  ;;  %v26_v39 = vld [vmem:[%s665_s5 + $0x2] sm:$0x1]  ;;  %p492_p3 = por %p491_p2, %p490_p1 }
   0xf   :  { %453 = vmatpush3.msra.mxu1 %v123_v12  ;;  %475 = vmatprep.subr.mxu0 %v507_v1 }
  0x10   :  { %454 = vmatprep.subr.mxu1 %v507_v1  ;;  %477 = vmatprep.mubr.msk.f32.mxu0 %vm508_vm0, %v507_v1  ;;  %p493_p4 = pnand %p492_p3, %p486_p0 }
  0x11   :  { %455 = vmatpush3.msra.mxu1 %v122_v13  ;;  %484 = vset.pattern.permute.xlu0 %v509_v32 }
  0x12   :  { %456 = vmatprep.subr.mxu1 %v507_v1  ;;  %290 = vperm.xlu0 %484, %v27_v31  }
  0x13   :  { %457 = vmatpush3.msra.mxu1 %v121_v14 }
  0x14   :  { %458 = vmatprep.subr.mxu1 %v507_v1 }
  0x15   :  { %459 = vmatpush3.msra.mxu1 %v120_v15 }
  0x16   :  { %460 = vmatprep.subr.mxu1 %v507_v1 }
  0x17   :  { %461 = vmatpush3.msra.mxu1 %v119_v16 }
  0x18   :  { %462 = vmatprep.subr.mxu1 %v507_v1 }
  0x19   :  { %463 = vmatpush3.msra.mxu1 %v118_v17 }
  0x1a   :  { %464 = vmatprep.subr.mxu1 %v507_v1 }
  0x1b   :  { %465 = vmatpush3.msra.mxu1 %v117_v18 }
  0x1c   :  { %466 = vmatprep.subr.mxu1 %v507_v1 }
  0x1d   :  { %467 = vmatpush3.msra.mxu1 %v116_v19 }
  0x1e   :  { %468 = vmatprep.subr.mxu1 %v507_v1 }
  0x1f   :  { %469 = vmatpush3.msra.mxu1 %v115_v21 }
  0x20   :  { %470 = vmatprep.subr.mxu1 %v507_v1 }
  0x21   :  { %471 = vmatpush3.msra.mxu1 %v114_v23 }
  0x8d   :  { %v291_v43 = vpop.permute.xlu0 %290 }
  0x8e   :  { %v296_v44 = vrot.slane %v291_v43, %v295_v42 }
  0xc9   :  { %v109_v25 = vpop.f32.mrf.mxu0 }
  0xca   :  { %v110_v26 = vadd.f32 %v391_v24, %v109_v25 }
  0xcb   :  { %v434_v27 = vpop.f32.mrf.mxu0 }
  0xcc   :  { %v113_v28 = vmax.f32 %v110_v26, 0.0 }
  0xce   :  { %473 = vmatmul.mubr.f32.vlgmr.msra.gmra.mxu1 %v113_v28  ;;  %v206_v29 = vpop.f32.mrf.mxu0 }
  0xd0   :  { %v439_v30 = vpop.f32.mrf.mxu0 }
 0x18e   :  { %v276_v34 = vpop.f32.mrf.mxu1 }
 0x18f   :  { %v277_v35 = vadd.f32 %v276_v34, %v206_v29 }
 0x190   :  { %v474_v36 = vpop.f32.mrf.mxu1 }
 0x191   :  { %v286_v37 = vadd.f32 %v395_v33, %v277_v35 }
 0x193   :  { %v287_v38 = vmax.f32 %v286_v37, 0.0 }
 0x195   :  { %476 = vmatpush3.xpose.msk.msra.mxu0 %vm297_vm4, %v287_v38 }
 0x198   :  { %478 = vmatmul.mubr.msk.f32.vlgmr.msra.gmra.mxu0 %vm297_vm4, %v26_v39 }
 0x258   :  { %v370_v45 = vpop.f32.mrf.mxu0 }
 0x259   :  { %v371_v46 = vadd.f32 %v370_v45, %v296_v44 }
 0x25a   :  { %v479_v47 = vpop.f32.mrf.mxu0 }
 0x25b   :  { %v374_v48 = vmax.f32 %v371_v46, 0.0 }
 0x25d   :  { %376 = vst.msk [vmem:[#allocation2] sm:$0x1] %vm375_vm5, %v374_v48 }
 0x25e   :  { %496 = shalt.err (!%p493_p4)
}
 0x25f   :  { %386 = dma.vmem_to_hbm [thread:$0]  %s384_s21, 16, %s666_s6, [#allocation3]  }
 0x260   :  { %505 = dma.done.wait [#allocation3], 16  }
 0x261   :  { %506 = vsyncadd [#allocation3], 4294967280 }
 0x262   :  { %390 = vsyncpa [#allocation3], 1 }

</bundles_post_ra>
